<compile_context>
chip_gen: v7x
topology: tpu7x:2x2x1
jax: 0.10.0
libtpu: 0.0.40
codegen_flags: <defaults>
</compile_context>

<pallas_src>
import jax
import jax.numpy as jnp
from jax.experimental import pallas as pl
from jax.experimental.pallas import tpu as pltpu

N_TEMPLATES = 25
REG_WEIGHT = 1.0
POS_FRACTION = 0.5
SAMPLE_SIZE = 256
HNM_THRESH = 0.03

LANE = 128
SUB = 8
VMEM_LIMIT = 32 * 1024 * 1024  # explicit; working sets below are ~6-10 MiB


def _round_up(x, m):
    return ((x + m - 1) // m) * m


def _soft_margin(pred, target):
    # SoftMarginLoss(reduction='none') = log(1 + exp(-target * pred)), stable form.
    a = -target * pred
    return jnp.maximum(a, 0.0) + jnp.log1p(jnp.exp(-jnp.abs(a)))


# ----------------------- Kernel A: hard negative mining -----------------------
def hnm_kernel(cls_ref, cm_ref, out_ref):
    cls = cls_ref[...]                       # (block_rows, 128)
    cm = cm_ref[...]
    loss_map = _soft_margin(cls, cm)
    out_ref[...] = jnp.where(loss_map < HNM_THRESH, jnp.zeros_like(cm), cm)


def _flat_to_lanes(x, rows_padded):
    flat = x.reshape(-1)
    pad = rows_padded * LANE - flat.shape[0]
    if pad:
        flat = jnp.pad(flat, (0, pad))
    return flat.reshape(rows_padded, LANE)


def hard_negative_mining(classification, class_map, max_block_rows=2048):
    shape = class_map.shape
    n = classification.size
    rows = pl.cdiv(n, LANE)
    block_rows = min(_round_up(rows, SUB), max_block_rows)
    rows_padded = _round_up(rows, block_rows)
    grid = (rows_padded // block_rows,)

    cls2 = _flat_to_lanes(classification.astype(jnp.float32), rows_padded)
    cm2 = _flat_to_lanes(class_map.astype(jnp.float32), rows_padded)

    out2 = pl.pallas_call(
        hnm_kernel,
        out_shape=jax.ShapeDtypeStruct((rows_padded, LANE), jnp.float32),
        grid_spec=pltpu.PrefetchScalarGridSpec(
            num_scalar_prefetch=0,
            grid=grid,
            in_specs=[
                pl.BlockSpec((block_rows, LANE), lambda g: (g, 0)),
                pl.BlockSpec((block_rows, LANE), lambda g: (g, 0)),
            ],
            out_specs=pl.BlockSpec((block_rows, LANE), lambda g: (g, 0)),
        ),
        compiler_params=pltpu.CompilerParams(
            dimension_semantics=("parallel",),
            vmem_limit_bytes=VMEM_LIMIT),
    )(cls2, cm2)
    return out2.reshape(-1)[:n].reshape(shape)


# ---------------- Glue: balance sampling (keep <= maxnum uniformly at random) ----------------
def balance_sample(class_map, key, pos_fraction=POS_FRACTION, sample_size=SAMPLE_SIZE):
    # TODO(synk): PyTorch uses np.random.permutation per batch item; same
    # keep-at-most-maxnum-uniformly-at-random semantics, different RNG stream.
    B = class_map.shape[0]
    flat = class_map.reshape(B, -1)
    n = flat.shape[1]
    pos_maxnum = int(sample_size * pos_fraction)
    neg_maxnum = int(pos_maxnum * (1.0 - pos_fraction) / pos_fraction)
    scores = jax.random.uniform(key, flat.shape)

    def keep_at_most(is_x, maxnum):
        if maxnum <= 0:
            return jnp.zeros_like(is_x)
        if maxnum >= n:
            return is_x
        s = jnp.where(is_x, scores, -1.0)
        kth = jax.lax.top_k(s, maxnum)[0][:, -1:]   # k-th largest member score
        return is_x & (s >= kth)

    is_pos = flat == 1.0
    is_neg = flat == -1.0
    keep = keep_at_most(is_pos, pos_maxnum) | keep_at_most(is_neg, neg_maxnum)
    out = jnp.where(keep, flat, 0.0)
    return out.reshape(class_map.shape)


# ----------------------- Kernel B: masked losses, per-tile partial sums -----------------------
def loss_kernel(cls_ref, cm_ref, reg_ref, rmap_ref, class_part_ref, reg_part_ref):
    cls = cls_ref[0]                         # (block_rows, 128)
    cm = cm_ref[0]                           # (block_rows, 128) balanced class map
    class_loss = _soft_margin(cls, cm)                       # SoftMarginLoss 'none'
    class_mask = (cm != 0.0).astype(jnp.float32)
    masked_class = class_mask * class_loss

    reg = reg_ref[0]                         # (4, block_rows, 128)
    rmap = rmap_ref[0]
    diff = reg - rmap
    adiff = jnp.abs(diff)
    sl1 = jnp.where(adiff < 1.0, 0.5 * diff * diff, adiff - 0.5)  # SmoothL1 beta=1
    sl1_q = jnp.sum(sl1, axis=0)             # (block_rows, 128) -- VPU adds of 4 slabs
    reg_mask = (cm > 0.0).astype(jnp.float32)                 # == repeat(1,4,1,1) mask
    masked_reg = reg_mask * sl1_q

    br = masked_class.shape[0]
    # VPU-only partial reduction to a single (8,128) vreg per tile (no XLU, no
    # masked scalar stores); the tiny cross-lane reduce happens outside the kernel.
    cpart = jnp.sum(masked_class.reshape(br // SUB, SUB, LANE), axis=0)
    rpart = jnp.sum(masked_reg.reshape(br // SUB, SUB, LANE), axis=0)
    class_part_ref[...] = cpart.reshape(1, 1, SUB, LANE)
    reg_part_ref[...] = rpart.reshape(1, 1, SUB, LANE)


def _to_batched_lanes(x, B, rows_padded):
    flat = x.reshape(B, -1)
    pad = rows_padded * LANE - flat.shape[1]
    if pad:
        flat = jnp.pad(flat, ((0, 0), (0, pad)))
    return flat.reshape(B, rows_padded, LANE)


def _to_batched_planes(x, B, rows_padded):
    flat = x.reshape(B, 4, -1)
    pad = rows_padded * LANE - flat.shape[2]
    if pad:
        flat = jnp.pad(flat, ((0, 0), (0, 0), (0, pad)))
    return flat.reshape(B, 4, rows_padded, LANE)


def masked_losses(classification, class_map, regression, regression_map,
                  max_block_rows=1024):
    B, T, H, W = classification.shape
    thw = T * H * W
    rows_b = pl.cdiv(thw, LANE)
    block_rows = min(_round_up(rows_b, SUB), max_block_rows)
    rows_padded = _round_up(rows_b, block_rows)
    G = rows_padded // block_rows

    cls3 = _to_batched_lanes(classification.astype(jnp.float32), B, rows_padded)
    cm3 = _to_batched_lanes(class_map.astype(jnp.float32), B, rows_padded)
    reg4 = _to_batched_planes(regression.astype(jnp.float32), B, rows_padded)
    rmap4 = _to_batched_planes(regression_map.astype(jnp.float32), B, rows_padded)

    part_shape = jax.ShapeDtypeStruct((B, G, SUB, LANE), jnp.float32)
    class_part, reg_part = pl.pallas_call(
        loss_kernel,
        out_shape=(part_shape, part_shape),
        grid_spec=pltpu.PrefetchScalarGridSpec(
            num_scalar_prefetch=0,
            grid=(B, G),
            in_specs=[
                pl.BlockSpec((1, block_rows, LANE), lambda b, g: (b, g, 0)),
                pl.BlockSpec((1, block_rows, LANE), lambda b, g: (b, g, 0)),
                pl.BlockSpec((1, 4, block_rows, LANE), lambda b, g: (b, 0, g, 0)),
                pl.BlockSpec((1, 4, block_rows, LANE), lambda b, g: (b, 0, g, 0)),
            ],
            out_specs=[
                pl.BlockSpec((1, 1, SUB, LANE), lambda b, g: (b, g, 0, 0)),
                pl.BlockSpec((1, 1, SUB, LANE), lambda b, g: (b, g, 0, 0)),
            ],
        ),
        compiler_params=pltpu.CompilerParams(
            dimension_semantics=("parallel", "parallel"),
            vmem_limit_bytes=VMEM_LIMIT),
    )(cls3, cm3, reg4, rmap4)

    class_sum = jnp.sum(class_part)
    reg_sum = jnp.sum(reg_part)
    total = class_sum + jnp.float32(REG_WEIGHT) * reg_sum
    return class_sum, reg_sum, total


# ----------------------- Module-like wrapper -----------------------
class AvgMeter:
    def __init__(self):
        self.average = 0.0
        self.num_averaged = 0

    def update(self, loss, size):
        # Keep `loss` on device (no float() -> no blocking host sync per step).
        n = self.num_averaged
        m = n + size
        self.average = (n * self.average + loss) / m
        self.num_averaged = m


class DetectionCriterion:
    def __init__(self, n_templates=N_TEMPLATES, reg_weight=REG_WEIGHT,
                 pos_fraction=POS_FRACTION):
        self.n_templates = n_templates
        self.reg_weight = reg_weight
        self.pos_fraction = pos_fraction
        self.class_average = AvgMeter()
        self.reg_average = AvgMeter()
        self.total_loss = None

    def __call__(self, output, class_map, regression_map, key):
        T = self.n_templates
        classification = output[:, :T]
        regression = output[:, T:]
        cm = hard_negative_mining(classification, class_map)        # Pallas kernel A
        cm = balance_sample(cm, key, self.pos_fraction)             # JAX glue (top_k)
        class_sum, reg_sum, total = masked_losses(                  # Pallas kernel B
            classification, cm, regression, regression_map)
        self.class_average.update(class_sum, output.shape[0])
        self.reg_average.update(reg_sum, output.shape[0])
        self.total_loss = total
        return total, cm


# ----------------------- Pure-JAX reference (for verification) -----------------------
def ref_losses(classification, cm, regression, regression_map):
    class_loss = _soft_margin(classification, cm)
    class_mask = (cm != 0.0).astype(classification.dtype)
    masked_class = class_mask * class_loss
    diff = regression - regression_map
    ad = jnp.abs(diff)
    sl1 = jnp.where(ad < 1.0, 0.5 * diff * diff, ad - 0.5)
    reg_mask = jnp.tile((cm > 0.0).astype(classification.dtype), (1, 4, 1, 1))
    masked_reg = reg_mask * sl1
    cs = masked_class.sum()
    rs = masked_reg.sum()
    return cs, rs, cs + REG_WEIGHT * rs


if __name__ == "__main__":
    B, T, H, W = 2, N_TEMPLATES, 8, 8
    key = jax.random.PRNGKey(0)
    k1, k2, k3, k4 = jax.random.split(key, 4)

    output = (2.0 * jax.random.normal(k1, (B, 5 * T, H, W))).astype(jnp.float32)
    class_map = (jax.random.randint(k2, (B, T, H, W), 0, 3) - 1).astype(jnp.float32)
    regression_map = jax.random.normal(k3, (B, 4 * T, H, W)).astype(jnp.float32)

    criterion = DetectionCriterion()
    total, balanced_cm = criterion(output, class_map, regression_map, k4)
    total = jax.block_until_ready(total)

    # Verify kernel A against pure-JAX hard negative mining.
    classification = output[:, :T]
    hnm_ref = jnp.where(_soft_margin(classification, class_map) < HNM_THRESH,
                        0.0, class_map)
    hnm_ker = hard_negative_mining(classification, class_map)
    assert jnp.allclose(hnm_ker, hnm_ref), "HNM kernel mismatch"

    # Balance sampling sanity: only zeroes entries, caps per-item pos/neg counts.
    assert bool(jnp.all((balanced_cm == 0.0) | (balanced_cm == hnm_ker))), \
        "balance_sample changed values"
    pos_counts = jnp.sum((balanced_cm == 1.0).reshape(B, -1), axis=1)
    neg_counts = jnp.sum((balanced_cm == -1.0).reshape(B, -1), axis=1)
    assert bool(jnp.all(pos_counts <= SAMPLE_SIZE * POS_FRACTION)), "too many positives kept"
    assert bool(jnp.all(neg_counts <= SAMPLE_SIZE * POS_FRACTION)), "too many negatives kept"

    # Verify kernel B (using the same balanced class_map) against pure JAX.
    _, _, ref_total = ref_losses(classification, balanced_cm,
                                 output[:, T:], regression_map)
    assert jnp.allclose(total, ref_total, rtol=3e-5, atol=1e-3), \
        f"loss kernel mismatch: {total} vs {ref_total}"

    print("KERNEL_OK")
</pallas_src>

<mosaic_0001>
module attributes {stable_mosaic.version = 11 : i64} {
  func.func @hnm_kernel(%arg0: i32, %arg1: memref<32x128xf32, #tpu.memory_space<vmem>>, %arg2: memref<32x128xf32, #tpu.memory_space<vmem>>, %arg3: memref<32x128xf32, #tpu.memory_space<vmem>>) attributes {dimension_semantics = [#tpu.dimension_semantics<parallel>], iteration_bounds = array<i64: 1>, scalar_prefetch = 0 : i64, scratch_operands = 0 : i64, tpu.core_type = #tpu.core_type<tc>, window_params = [{transform_indices = @transform_0, window_bounds = array<i64: 32, 128>}, {transform_indices = @transform_1, window_bounds = array<i64: 32, 128>}, {transform_indices = @transform_2, window_bounds = array<i64: 32, 128>}]} {
    %c0 = arith.constant 0 : index
    %c0_0 = arith.constant 0 : index
    %0 = vector.load %arg1[%c0, %c0_0] : memref<32x128xf32, #tpu.memory_space<vmem>>, vector<32x128xf32>
    %c0_1 = arith.constant 0 : index
    %c0_2 = arith.constant 0 : index
    %1 = vector.load %arg2[%c0_1, %c0_2] : memref<32x128xf32, #tpu.memory_space<vmem>>, vector<32x128xf32>
    %cst = arith.constant 0.000000e+00 : f32
    %2 = vector.broadcast %cst : f32 to vector<32x128xf32>
    %3 = arith.subf %2, %1 : vector<32x128xf32>
    %4 = arith.mulf %3, %0 : vector<32x128xf32>
    %cst_3 = arith.constant 0.000000e+00 : f32
    %5 = vector.broadcast %cst_3 : f32 to vector<32x128xf32>
    %6 = arith.maximumf %4, %5 : vector<32x128xf32>
    %7 = math.absf %4 : vector<32x128xf32>
    %cst_4 = arith.constant 0.000000e+00 : f32
    %8 = vector.broadcast %cst_4 : f32 to vector<32x128xf32>
    %9 = arith.subf %8, %7 : vector<32x128xf32>
    %10 = math.exp %9 : vector<32x128xf32>
    %11 = math.log1p %10 : vector<32x128xf32>
    %12 = arith.addf %6, %11 : vector<32x128xf32>
    %cst_5 = arith.constant 3.000000e-02 : f32
    %13 = vector.broadcast %cst_5 : f32 to vector<32x128xf32>
    %14 = arith.cmpf olt, %12, %13 : vector<32x128xf32>
    %cst_6 = arith.constant 0.000000e+00 : f32
    %15 = vector.broadcast %cst_6 : f32 to vector<32x128xf32>
    %16 = arith.select %14, %15, %1 : vector<32x128xi1>, vector<32x128xf32>
    %c0_7 = arith.constant 0 : index
    %c0_8 = arith.constant 0 : index
    %17 = vector.load %arg3[%c0_7, %c0_8] : memref<32x128xf32, #tpu.memory_space<vmem>>, vector<32x128xf32>
    tpu.vector_store %arg3[%c0_7, %c0_8], %16 {strides = array<i32>} : memref<32x128xf32, #tpu.memory_space<vmem>>, vector<32x128xf32>,
    return
  }
  func.func @transform_0(%arg0: i32) -> (i32, i32) {
    %c0_i32 = arith.constant 0 : i32
    %c0_i32_0 = arith.constant 0 : i32
    return %arg0, %c0_i32 : i32, i32
  }
  func.func @transform_1(%arg0: i32) -> (i32, i32) {
    %c0_i32 = arith.constant 0 : i32
    %c0_i32_0 = arith.constant 0 : i32
    return %arg0, %c0_i32 : i32, i32
  }
  func.func @transform_2(%arg0: i32) -> (i32, i32) {
    %c0_i32 = arith.constant 0 : i32
    %c0_i32_0 = arith.constant 0 : i32
    return %arg0, %c0_i32 : i32, i32
  }
}

</mosaic_0001>

<bundles_post_ra>
// kernel: tpu_custom_call.1
= control target key start
LH: loop header
LB: loop body
LE: loop exit
PB: predicated region body
PF: predicated region fallthrough
CT: control target
= control target key end

     0   :  { %7 = vsyncpa [#allocation3], 0  ;;  %s342_s0 = inlined_call_operand.hbm [shape: f32[32,128], index: 0, kind: input, shape index: {}]   ;;  %s343_s1 = inlined_call_operand.hbm [shape: f32[32,128], index: 1, kind: input, shape index: {}]   ;;  %s344_s2 = inlined_call_operand.hbm [shape: f32[32,128], index: 2, kind: output, shape index: {}]  }
   0x1   :  { %8 = vsyncpa [#allocation6], 0 }
   0x2   :  { %9 = vsyncpa [#allocation4], 0  ;;  %s239_s9 = smov [#allocation2]   ;;  %s167_s13 = scalar_lea.hbm %s342_s0, 512 }
   0x3   :  { %s15_s10 = sshll.u32 %s239_s9, 4  ;;  %p168_p0 = scmp.ne.s32.totalorder %s342_s0, %s167_s13  ;;  %s16_s10 = int_to_ptr.vmem [resolvable:$true] %s15_s10 }
   0x4   :  { %p171_p1 = scmp.lt.u32.totalorder %s167_s13, %s342_s0 }
   0x6   :  { %p173_p2 = pnand %p171_p1, %p168_p0 }
   0x8   :  { %176 = shalt.err (!%p173_p2)
}
   0x9   :  { %s177_s18 = scalar_lea.vmem %s16_s10, 512  ;;  %p182_p4 = scmp.lt.s32.totalorder %s16_s10, %s16_s10 }
   0xa   :  { %p178_p3 = scmp.ne.s32.totalorder %s16_s10, %s177_s18  ;;  %p183_p5 = scmp.lt.s32.totalorder %s177_s18, %s177_s18 }
   0xc   :  { %p184_p6 = por %p183_p5, %p182_p4 }
   0xe   :  { %p185_p7 = pnand %p184_p6, %p178_p3 }
  0x10   :  { %188 = shalt.err (!%p185_p7)
}
  0x11   :  { %s240_s19 = smov 128   ;;  %s241_s20 = smov 8  }
  0x12   :  { %21 = dma.hbm_to_vmem [thread:$0]  %s342_s0, 512, %s16_s10, [#allocation3], %s240_s19, %s240_s19, %s241_s20  }
  0x13   :  { %s242_s23 = smov [#allocation5]   ;;  %s189_s27 = scalar_lea.hbm %s343_s1, 512 }
  0x14   :  { %s27_s24 = sshll.u32 %s242_s23, 4  ;;  %p190_p8 = scmp.ne.s32.totalorder %s343_s1, %s189_s27  ;;  %s28_s24 = int_to_ptr.vmem [resolvable:$true] %s27_s24 }
  0x15   :  { %p193_p9 = scmp.lt.u32.totalorder %s189_s27, %s343_s1 }
  0x17   :  { %p195_p10 = pnand %p193_p9, %p190_p8 }
  0x19   :  { %198 = shalt.err (!%p195_p10)
}
  0x1a   :  { %s199_s4 = scalar_lea.vmem %s28_s24, 512  ;;  %p204_p12 = scmp.lt.s32.totalorder %s28_s24, %s28_s24 }
  0x1b   :  { %p200_p11 = scmp.ne.s32.totalorder %s28_s24, %s199_s4  ;;  %p205_p13 = scmp.lt.s32.totalorder %s199_s4, %s199_s4 }
  0x1d   :  { %p206_p0 = por %p205_p13, %p204_p12 }
  0x1f   :  { %p207_p1 = pnand %p206_p0, %p200_p11 }
  0x21   :  { %210 = shalt.err (!%p207_p1)
}
  0x22   :  { %33 = dma.hbm_to_vmem [thread:$0]  %s343_s1, 512, %s28_s24, [#allocation6], %s240_s19, %s240_s19, %s241_s20  }
  0x23   :  { %233 = dma.done.wait [#allocation3], 512  }
  0x24   :  { %234 = vsyncadd [#allocation3], 4294966784 }
  0x25   :  { %235 = dma.done.wait [#allocation6], 512  }
  0x26   :  { %236 = vsyncadd [#allocation6], 4294966784  ;;  %v40_v0 = vld [vmem:[#allocation2] sm:$0xff]  ;;  %v41_v2 = vld [vmem:[#allocation2 + $0x8] sm:$0xff]  ;;  %s243_s1 = smov [#allocation7]  }
  0x27   :  { %v289_v1 = vld [vmem:[#allocation5] sm:$0xff]  ;;  %v292_v4 = vld [vmem:[#allocation5 + $0x8] sm:$0xff]  ;;  %v42_v5 = vld [vmem:[#allocation2 + $0x10] sm:$0xff]  ;;  %s133_s6 = sshll.u32 %s243_s1, 4  ;;  %s134_s6 = int_to_ptr.vmem [resolvable:$true] %s133_s6 }
  0x28   :  { %v48_v3 = vsub.f32 0.0, %v289_v1  ;;  %v294_v6 = vld [vmem:[#allocation5 + $0x10] sm:$0xff]  ;;  %v49_v7 = vsub.f32 0.0, %v292_v4  ;;  %v43_v9 = vld [vmem:[#allocation2 + $0x18] sm:$0xff]  ;;  %s211_s7 = scalar_lea.vmem %s134_s6, 512  ;;  %p216_p3 = scmp.lt.s32.totalorder %s134_s6, %s134_s6 }
  0x29   :  { %v50_v8 = vsub.f32 0.0, %v294_v6  ;;  %v298_v10 = vld [vmem:[#allocation5 + $0x18] sm:$0xff]  ;;  %p212_p2 = scmp.ne.s32.totalorder %s134_s6, %s211_s7  ;;  %p217_p4 = scmp.lt.s32.totalorder %s211_s7, %s211_s7 }
  0x2a   :  { %v300_v11 = vmul.f32 %v48_v3, %v40_v0  ;;  %v51_v12 = vsub.f32 0.0, %v298_v10  ;;  %v303_v13 = vmul.f32 %v49_v7, %v41_v2 }
  0x2b   :  { %v305_v14 = vmul.f32 %v50_v8, %v42_v5  ;;  %p218_p5 = por %p217_p4, %p216_p3 }
  0x2c   :  { %v60_v15 = vand.u32 2147483647, %v300_v11  ;;  %v308_v16 = vmul.f32 %v51_v12, %v43_v9  ;;  %v61_v17 = vand.u32 2147483647, %v303_v13  ;;  %v56_v49 = vmax.f32 %v300_v11, 0.0 }
  0x2d   :  { %v62_v18 = vand.u32 2147483647, %v305_v14  ;;  %v57_v55 = vmax.f32 %v303_v13, 0.0  ;;  %v58_v59 = vmax.f32 %v305_v14, 0.0  ;;  %p219_p6 = pnand %p218_p5, %p212_p2 }
  0x2e   :  { %v64_v19 = vsub.f32 0.0, %v60_v15  ;;  %v63_v20 = vand.u32 2147483647, %v308_v16  ;;  %v65_v21 = vsub.f32 0.0, %v61_v17  ;;  %v59_v3 = vmax.f32 %v308_v16, 0.0 }
  0x2f   :  { %v66_v22 = vsub.f32 0.0, %v62_v18 }
  0x30   :  { %v68_v23 = vmul.f32 1.442695, %v64_v19  ;;  %v67_v24 = vsub.f32 0.0, %v63_v20  ;;  %v70_v25 = vmul.f32 1.442695, %v65_v21 }
  0x31   :  { %v72_v26 = vmul.f32 1.442695, %v66_v22 }
  0x32   :  { %151 = vpow2.f32 %v68_v23  ;;  %v74_v27 = vmul.f32 1.442695, %v67_v24 }
  0x33   :  { %153 = vpow2.f32 %v70_v25 }
  0x34   :  { %155 = vpow2.f32 %v72_v26 }
  0x35   :  { %157 = vpow2.f32 %v74_v27 }
  0x3c   :  { %v152_v28 = vpop.eup %151 }
  0x3d   :  { %v154_v29 = vpop.eup %153  ;;  %v76_v30 = vadd.f32 1.0, %v152_v28  ;;  %v79_v35 = vmul.f32 -0.5, %v152_v28  ;;  %v82_v41 = vand.u32 2147483647, %v152_v28 }
  0x3e   :  { %v156_v31 = vpop.eup %155  ;;  %v85_v32 = vadd.f32 1.0, %v154_v29  ;;  %v88_v36 = vmul.f32 -0.5, %v154_v29  ;;  %v91_v43 = vand.u32 2147483647, %v154_v29 }
  0x3f   :  { %v158_v33 = vpop.eup %157  ;;  %159 = vlog2.f32 %v76_v30  ;;  %v94_v34 = vadd.f32 1.0, %v156_v31  ;;  %v97_v38 = vmul.f32 -0.5, %v156_v31  ;;  %v80_v39 = vadd.f32 1.0, %v79_v35 }
  0x40   :  { %161 = vlog2.f32 %v85_v32  ;;  %v103_v37 = vadd.f32 1.0, %v158_v33  ;;  %v106_v40 = vmul.f32 -0.5, %v158_v33  ;;  %v89_v42 = vadd.f32 1.0, %v88_v36 }
  0x41   :  { %163 = vlog2.f32 %v94_v34  ;;  %v98_v44 = vadd.f32 1.0, %v97_v38  ;;  %v100_v45 = vand.u32 2147483647, %v156_v31  ;;  %v81_v46 = vmul.f32 %v152_v28, %v80_v39 }
  0x42   :  { %165 = vlog2.f32 %v103_v37  ;;  %v107_v47 = vadd.f32 1.0, %v106_v40  ;;  %vm314_vm0 = vcmp.lt.f32.partialorder %v82_v41, 0.0004427343  ;;  %v90_v51 = vmul.f32 %v154_v29, %v89_v42 }
  0x43   :  { %v109_v52 = vand.u32 2147483647, %v158_v33  ;;  %vm92_vm1 = vcmp.lt.f32.partialorder %v91_v43, 0.0004427343  ;;  %v99_v56 = vmul.f32 %v156_v31, %v98_v44  ;;  %vm101_vm2 = vcmp.lt.f32.partialorder %v100_v45, 0.0004427343 }
  0x44   :  { %v108_v62 = vmul.f32 %v158_v33, %v107_v47 }
  0x45   :  { %vm110_vm3 = vcmp.lt.f32.partialorder %v109_v52, 0.0004427343 }
  0x49   :  { %v160_v48 = vpop.eup %159 }
  0x4a   :  { %v162_v53 = vpop.eup %161  ;;  %v78_v54 = vmul.f32 0.6931472, %v160_v48 }
  0x4b   :  { %v164_v57 = vpop.eup %163  ;;  %v87_v58 = vmul.f32 0.6931472, %v162_v53 }
  0x4c   :  { %v84_v60 = vsel %vm314_vm0, %v81_v46, %v78_v54  ;;  %v96_v61 = vmul.f32 0.6931472, %v164_v57  ;;  %v166_v63 = vpop.eup %165 }
  0x4d   :  { %v112_v0 = vadd.f32 %v84_v60, %v56_v49  ;;  %v93_v2 = vsel %vm92_vm1, %v90_v51, %v87_v58  ;;  %v105_v8 = vmul.f32 0.6931472, %v166_v63 }
  0x4e   :  { %v113_v5 = vadd.f32 %v93_v2, %v57_v55  ;;  %v102_v7 = vsel %vm101_vm2, %v99_v56, %v96_v61 }
  0x4f   :  { %vm116_vm4 = vcmp.lt.f32.partialorder %v112_v0, 0.03  ;;  %v114_v9 = vadd.f32 %v102_v7, %v58_v59  ;;  %v111_v12 = vsel %vm110_vm3, %v108_v62, %v105_v8 }
  0x50   :  { %v120_v11 = vsel %vm116_vm4, 0.0, %v289_v1  ;;  %vm117_vm5 = vcmp.lt.f32.partialorder %v113_v5, 0.03  ;;  %v115_v14 = vadd.f32 %v111_v12, %v59_v3 }
  0x51   :  { %124 = vst [vmem:[#allocation7] sm:$0xff] %v120_v11  ;;  %v121_v13 = vsel %vm117_vm5, 0.0, %v292_v4  ;;  %vm118_vm6 = vcmp.lt.f32.partialorder %v114_v9, 0.03 }
  0x52   :  { %125 = vst [vmem:[#allocation7 + $0x8] sm:$0xff] %v121_v13  ;;  %v122_v15 = vsel %vm118_vm6, 0.0, %v294_v6  ;;  %vm119_vm7 = vcmp.lt.f32.partialorder %v115_v14, 0.03 }
  0x53   :  { %126 = vst [vmem:[#allocation7 + $0x10] sm:$0xff] %v122_v15  ;;  %v123_v16 = vsel %vm119_vm7, 0.0, %v298_v10 }
  0x54   :  { %127 = vst [vmem:[#allocation7 + $0x18] sm:$0xff] %v123_v16 }
  0x55   :  { %222 = shalt.err (!%p219_p6)
}
  0x56   :  { %s223_s10 = scalar_lea.hbm %s344_s2, 512 }
  0x57   :  { %p224_p7 = scmp.ne.s32.totalorder %s344_s2, %s223_s10  ;;  %p227_p8 = scmp.lt.u32.totalorder %s223_s10, %s344_s2 }
  0x59   :  { %p229_p9 = pnand %p227_p8, %p224_p7 }
  0x5b   :  { %232 = shalt.err (!%p229_p9)
}
  0x5c   :  { %139 = dma.vmem_to_hbm [thread:$0]  %s134_s6, 512, %s344_s2, [#allocation4], %s240_s19, %s240_s19, %s241_s20  }
  0x5d   :  { %237 = dma.done.wait [#allocation4], 512  }
  0x5e   :  { %238 = vsyncadd [#allocation4], 4294966784 }
  0x5f   :  { %143 = vsyncpa [#allocation3], 1 }
  0x60   :  { %144 = vsyncpa [#allocation6], 1 }
  0x61   :  { %145 = vsyncpa [#allocation4], 1 }

</bundles_post_ra>
